<compile_context>
chip_gen: v7x
topology: tpu7x:2x2x1
jax: 0.10.0
libtpu: 0.0.40
codegen_flags: <defaults>
</compile_context>

<pallas_src>
import jax
import jax.numpy as jnp
from jax.experimental import pallas as pl
from jax.experimental.pallas import tpu as pltpu

_NEG = -1e30  # additive mask sentinel; relu() of anything this negative is 0


# ----------------------------------------------------------------------------
# Kernel
# ----------------------------------------------------------------------------
def _splade_kernel(h_ref, w_ref, b_ref, m_ref, o_ref, acc_ref):
    # h_ref  : (TB, TS, H) bf16  hidden-state chunk (TB batch rows, TS seq rows)
    # w_ref  : (H, TV)     bf16  MLM-head weight tile (resident across b, s)
    # b_ref  : (1, TV)     f32   MLM-head bias tile
    # m_ref  : (TB, TS, 1) f32   additive attention mask: 0 (keep) / -1e30 (drop)
    # o_ref  : (TB, TV)    f32   max-pooled sparse activations (written at last s)
    # acc_ref: (TB, TV)    f32   VMEM running max over the seq grid axis
    s = pl.program_id(2)

    @pl.when(s == 0)
    def _init():
        acc_ref[...] = jnp.full(acc_ref.shape, _NEG, acc_ref.dtype)

    tb = h_ref.shape[0]

    def row(t, carry):
        # (TS, H) x (H, TV) on the MXU with f32 accumulation.
        logits = jnp.dot(h_ref[t], w_ref[...],
                         preferred_element_type=jnp.float32)        # (TS, TV)
        # Fused additive-mask + seq-chunk max: masked rows become ~-1e30 and
        # never win the max.  No separate "masked" logits buffer is kept live.
        chunk = jnp.max(logits + m_ref[t], axis=0, keepdims=True)    # (1, TV)
        acc_ref[pl.ds(t, 1), :] = jnp.maximum(acc_ref[pl.ds(t, 1), :], chunk)
        return carry

    # fori_loop (not a static Python for) bounds the live range of each row's
    # logits chunk; each iteration is matmul-dominated so loop overhead is noise.
    jax.lax.fori_loop(0, tb, row, None)

    @pl.when(s == pl.num_programs(2) - 1)
    def _finalize():
        # log1p∘relu is monotone and the bias is constant over seq, so applying
        # bias + relu + log1p AFTER the running max is equivalent and S-fold
        # cheaper.  Fully-masked rows: -1e30 + bias -> relu -> 0.
        o_ref[...] = jnp.log1p(jnp.maximum(acc_ref[...] + b_ref[...], 0.0))


# ----------------------------------------------------------------------------
# Tile / VMEM-budget selection
# ----------------------------------------------------------------------------
def _round_up(x, m):
    return ((x + m - 1) // m) * m


def _largest_divisor(n, cap):
    for t in range(max(1, min(cap, n)), 0, -1):
        if n % t == 0:
            return t
    return 1


def _vmem_bytes(tile_b, tile_s, tile_v, H):
    """Padded-layout VMEM estimate for one grid step (double-buffered blocks)."""
    db = 2
    hidden = tile_b * _round_up(tile_s, 16) * _round_up(H, 128) * 2 * db
    w = _round_up(H, 16) * _round_up(tile_v, 128) * 2 * db
    bias = 8 * _round_up(tile_v, 128) * 4 * db                       # sublane-padded
    mask = tile_b * _round_up(tile_s, 8) * 128 * 4 * db              # last dim 1 lane-pads to 128
    outb = _round_up(tile_b, 8) * _round_up(tile_v, 128) * 4 * db
    acc = _round_up(tile_b, 8) * _round_up(tile_v, 128) * 4
    live = 2 * _round_up(tile_s, 8) * _round_up(tile_v, 128) * 4     # one row's logits + temp
    return hidden + w + bias + mask + outb + acc + live


def _pick_config(B, S, H, V):
    try:
        info = pltpu.get_tpu_info()
        vmem_cap = int(getattr(info, "vmem_capacity_bytes", 64 * 2**20))
    except Exception:
        vmem_cap = 64 * 2**20
    # Per-generation scoped-VMEM budget: ~56% of 64 MiB on v7x-class chips,
    # generous (96 MiB) on 128-MiB-VMEM chips (v5e / v6e).
    budget = (36 * 2**20) if vmem_cap <= (64 * 2**20) else (96 * 2**20)

    tile_b = _largest_divisor(B, 8)
    tile_s = S if S <= 256 else 256
    v_cap = 4096 if budget >= 64 * 2**20 else 2048
    tile_v = min(v_cap, _round_up(V, 128))
    tile_v = _round_up(tile_v, 128)

    # Shrink tile_v first (keep lane-dense multiples of 128), then seq, then batch.
    while _vmem_bytes(tile_b, tile_s, tile_v, H) > budget and tile_v > 128:
        tile_v = max(128, _round_up(tile_v // 2, 128))
    while (_vmem_bytes(tile_b, tile_s, tile_v, H) > budget
           and tile_s >= 16 and tile_s % 16 == 0):
        tile_s //= 2
    while _vmem_bytes(tile_b, tile_s, tile_v, H) > budget and tile_b > 1:
        tile_b = _largest_divisor(B, max(1, tile_b // 2))

    return tile_b, tile_s, tile_v, budget


# ----------------------------------------------------------------------------
# Wrapper
# ----------------------------------------------------------------------------
def splade_no_topk(hidden, w_vocab, b_vocab, attention_mask):
    """hidden: [B,S,H] f32/bf16, w_vocab: [H,V], b_vocab: [V],
    attention_mask: [B,S] (0/1).  Returns [B,V] f32 SPLADE term weights."""
    B, S, H = hidden.shape
    V = w_vocab.shape[1]

    tile_b, tile_s, tile_v, vmem_budget = _pick_config(B, S, H, V)
    S_pad = _round_up(S, tile_s)
    V_pad = _round_up(V, tile_v)

    # bf16 matmul operands, f32 accumulation.  NOTE: at production scale the W
    # cast should be hoisted to init (cache bf16 weights) instead of per call.
    h = hidden if hidden.dtype == jnp.bfloat16 else hidden.astype(jnp.bfloat16)
    w = w_vocab if w_vocab.dtype == jnp.bfloat16 else w_vocab.astype(jnp.bfloat16)
    b = b_vocab.astype(jnp.float32)

    if S_pad != S:
        h = jnp.pad(h, ((0, 0), (0, S_pad - S), (0, 0)))           # padded rows get -1e30 mask
    if V_pad != V:
        w = jnp.pad(w, ((0, 0), (0, V_pad - V)))                   # zero cols pool to 0, sliced off
        b = jnp.pad(b, (0, V_pad - V))
    bias2d = b.reshape(1, V_pad)

    # Additive mask: 0 keep / -1e30 drop.  (Assumes a 0/1 attention mask, which
    # makes this equivalent to the reference's multiplicative masking.)
    m = jnp.where(attention_mask > 0, 0.0, _NEG).astype(jnp.float32)
    if S_pad != S:
        m = jnp.pad(m, ((0, 0), (0, S_pad - S)), constant_values=_NEG)
    mask3 = m.reshape(B, S_pad, 1)

    nv, nb, ns = V_pad // tile_v, B // tile_b, S_pad // tile_s
    grid = (nv, nb, ns)   # vocab outer, batch mid, seq inner: W tile fetched once per v

    flops = int(2 * B * S_pad * H * V_pad)
    bytes_accessed = int(nv * B * S_pad * H * 2      # hidden re-streamed per vocab tile
                         + H * V_pad * 2             # W streamed once
                         + nv * B * S_pad * 4        # mask
                         + V_pad * 4                 # bias
                         + B * V_pad * 4)            # output

    out = pl.pallas_call(
        _splade_kernel,
        out_shape=jax.ShapeDtypeStruct((B, V_pad), jnp.float32),
        grid_spec=pltpu.PrefetchScalarGridSpec(
            num_scalar_prefetch=0,
            grid=grid,
            in_specs=[
                pl.BlockSpec((tile_b, tile_s, H), lambda v, bb, s: (bb, s, 0)),  # hidden chunk
                pl.BlockSpec((H, tile_v), lambda v, bb, s: (0, v)),              # W tile
                pl.BlockSpec((1, tile_v), lambda v, bb, s: (0, v)),              # bias tile
                pl.BlockSpec((tile_b, tile_s, 1), lambda v, bb, s: (bb, s, 0)),  # additive mask
            ],
            out_specs=pl.BlockSpec((tile_b, tile_v), lambda v, bb, s: (bb, v)),
            scratch_shapes=[pltpu.VMEM((tile_b, tile_v), jnp.float32)],          # running max
        ),
        compiler_params=pltpu.CompilerParams(
            dimension_semantics=("parallel", "parallel", "arbitrary"),
            vmem_limit_bytes=int(vmem_budget),
        ),
        cost_estimate=pl.CostEstimate(
            flops=flops, transcendentals=int(B * V_pad), bytes_accessed=bytes_accessed),
    )(h, w, bias2d, mask3)

    return out[:, :V] if V_pad != V else out


# ----------------------------------------------------------------------------
# Pure-JAX reference (mirrors the PyTorch module)
# ----------------------------------------------------------------------------
def reference_splade(hidden, w_vocab, b_vocab, attention_mask):
    logits = jnp.einsum("bsh,hv->bsv", hidden, w_vocab) + b_vocab
    act = jnp.log1p(jax.nn.relu(logits)) * attention_mask.astype(jnp.float32)[..., None]
    return jnp.max(act, axis=1)


# ----------------------------------------------------------------------------
# Demo / self-check
# ----------------------------------------------------------------------------
if __name__ == "__main__":
    def run_case(key, B, S, H, V, attention_mask):
        k_embed, k_w, k_b, k_ids = jax.random.split(key, 4)
        # Deterministic "transformer" parameters (tiny MLM head).
        embed_table = jax.random.normal(k_embed, (V, H), dtype=jnp.float32) * 0.5
        w_vocab = jax.random.normal(k_w, (H, V), dtype=jnp.float32) * 0.1
        b_vocab = jax.random.normal(k_b, (V,), dtype=jnp.float32) * 0.1
        input_ids = jax.random.randint(k_ids, (B, S), 0, V, dtype=jnp.int32)

        # Glue: embedding lookup produces the "transformer" hidden states.
        # TODO(synk): full transformer encoder stack is out of scope; logits are
        # produced by the fused (hidden @ W + b) MLM head inside the Pallas kernel.
        hidden = jnp.take(embed_table, input_ids, axis=0)  # [B, S, H]

        values = splade_no_topk(hidden, w_vocab, b_vocab, attention_mask)
        values = jax.block_until_ready(values)
        ref = reference_splade(hidden, w_vocab, b_vocab, attention_mask)
        assert values.shape == (B, V)
        # bf16 matmul operands (f32 accumulation) vs f32 reference -> loose tolerance.
        assert jnp.allclose(values, ref, atol=1e-2, rtol=1e-2), "mismatch vs reference"

    key = jax.random.PRNGKey(0)
    k1, k2 = jax.random.split(key)

    # Case 1: nice small shapes (B=2, S=8, H=32, V=256).
    mask1 = jnp.array([[1, 1, 1, 1, 1, 1, 0, 0],
                       [1, 1, 1, 1, 1, 1, 1, 1]], dtype=jnp.int32)
    run_case(k1, B=2, S=8, H=32, V=256, attention_mask=mask1)

    # Case 2: awkward shapes exercising vocab padding and an all-masked row
    # (B=3, S=10, V=200 -> padded to a 256-wide vocab tile, sliced back).
    mask2 = jnp.array([[1] * 7 + [0] * 3,
                       [1] * 10,
                       [0] * 10], dtype=jnp.int32)
    run_case(k2, B=3, S=10, H=32, V=200, attention_mask=mask2)

    print("KERNEL_OK")
</pallas_src>

<mosaic_0001>
module attributes {stable_mosaic.version = 11 : i64} {
  func.func @_splade_kernel(%arg0: i32, %arg1: i32, %arg2: i32, %arg3: memref<2x8x32xbf16, #tpu.memory_space<vmem>>, %arg4: memref<32x256xbf16, #tpu.memory_space<vmem>>, %arg5: memref<1x256xf32, #tpu.memory_space<vmem>>, %arg6: memref<2x8x1xf32, #tpu.memory_space<vmem>>, %arg7: memref<2x256xf32, #tpu.memory_space<vmem>>, %arg8: memref<2x256xf32, #tpu.memory_space<vmem>>) attributes {dimension_semantics = [#tpu.dimension_semantics<parallel>, #tpu.dimension_semantics<parallel>, #tpu.dimension_semantics<arbitrary>], iteration_bounds = array<i64: 1, 1, 1>, scalar_prefetch = 0 : i64, scratch_operands = 1 : i64, tpu.core_type = #tpu.core_type<tc>, window_params = [{transform_indices = @transform_0, window_bounds = array<i64: 2, 8, 32>}, {transform_indices = @transform_1, window_bounds = array<i64: 32, 256>}, {transform_indices = @transform_2, window_bounds = array<i64: 1, 256>}, {transform_indices = @transform_3, window_bounds = array<i64: 2, 8, 1>}, {transform_indices = @transform_4, window_bounds = array<i64: 2, 256>}]} {
    %c0_i32 = arith.constant 0 : i32
    %0 = arith.cmpi eq, %arg2, %c0_i32 : i32
    %1 = arith.extui %0 : i1 to i32
    %c0_i32_0 = arith.constant 0 : i32
    %2 = arith.cmpi ne, %1, %c0_i32_0 : i32
    scf.if %2 {
      %cst = arith.constant -1.000000e+30 : f32
      %7 = vector.broadcast %cst : f32 to vector<2x256xf32>
      %c0 = arith.constant 0 : index
      %c0_5 = arith.constant 0 : index
      %8 = vector.load %arg8[%c0, %c0_5] : memref<2x256xf32, #tpu.memory_space<vmem>>, vector<2x256xf32>
      tpu.vector_store %arg8[%c0, %c0_5], %7 {strides = array<i32>} : memref<2x256xf32, #tpu.memory_space<vmem>>, vector<2x256xf32>,
    } else {
    }
    %c0_i32_1 = arith.constant 0 : i32
    %c2_i32 = arith.constant 2 : i32
    %3 = arith.addi %c0_i32_1, %c2_i32 : i32
    %c1_i32 = arith.constant 1 : i32
    scf.for %arg9 = %c0_i32_1 to %3 step %c1_i32  : i32 {
      %7 = arith.index_cast %arg9 : i32 to index
      %c0 = arith.constant 0 : index
      %c0_5 = arith.constant 0 : index
      %8 = vector.load %arg3[%7, %c0, %c0_5] : memref<2x8x32xbf16, #tpu.memory_space<vmem>>, vector<1x8x32xbf16>
      %9 = vector.shape_cast %8 : vector<1x8x32xbf16> to vector<8x32xbf16>
      %c0_6 = arith.constant 0 : index
      %c0_7 = arith.constant 0 : index
      %10 = vector.load %arg4[%c0_6, %c0_7] : memref<32x256xbf16, #tpu.memory_space<vmem>>, vector<32x256xbf16>
      %cst = arith.constant dense<0.000000e+00> : vector<8x256xf32>
      %11 = tpu.matmul %9, %10, %cst {dimension_numbers = #tpu.dot_dimension_numbers<[1], [0], [0], [1], [0, 0, 1, 1], [], []>} : vector<8x32xbf16>, vector<32x256xbf16>, vector<8x256xf32> -> vector<8x256xf32>
      %12 = arith.index_cast %arg9 : i32 to index
      %c0_8 = arith.constant 0 : index
      %c0_9 = arith.constant 0 : index
      %13 = vector.load %arg6[%12, %c0_8, %c0_9] : memref<2x8x1xf32, #tpu.memory_space<vmem>>, vector<1x8x1xf32>
      %14 = vector.shape_cast %13 : vector<1x8x1xf32> to vector<8x1xf32>
      %15 = vector.broadcast %14 : vector<8x1xf32> to vector<8x256xf32>
      %16 = arith.addf %11, %15 : vector<8x256xf32>
      %cst_10 = arith.constant dense<0xFF800000> : vector<256xf32>
      %17 = vector.multi_reduction <maximumf>, %16, %cst_10 [0] : vector<8x256xf32> to vector<256xf32>
      %18 = vector.shape_cast %17 : vector<256xf32> to vector<1x256xf32>
      %19 = arith.index_cast %arg9 : i32 to index
      %c0_11 = arith.constant 0 : index
      %20 = vector.load %arg8[%19, %c0_11] : memref<2x256xf32, #tpu.memory_space<vmem>>, vector<1x256xf32>
      %21 = arith.maximumf %20, %18 : vector<1x256xf32>
      %22 = arith.index_cast %arg9 : i32 to index
      %c0_12 = arith.constant 0 : index
      %23 = vector.load %arg8[%22, %c0_12] : memref<2x256xf32, #tpu.memory_space<vmem>>, vector<1x256xf32>
      tpu.vector_store %arg8[%22, %c0_12], %21 {strides = array<i32>} : memref<2x256xf32, #tpu.memory_space<vmem>>, vector<1x256xf32>,
    }
    %c2_i32_2 = arith.constant 2 : i32
    %c0_i32_3 = arith.constant 0 : i32
    %4 = arith.cmpi eq, %arg2, %c0_i32_3 : i32
    %5 = arith.extui %4 : i1 to i32
    %c0_i32_4 = arith.constant 0 : i32
    %6 = arith.cmpi ne, %5, %c0_i32_4 : i32
    scf.if %6 {
      %c0 = arith.constant 0 : index
      %c0_5 = arith.constant 0 : index
      %7 = vector.load %arg8[%c0, %c0_5] : memref<2x256xf32, #tpu.memory_space<vmem>>, vector<2x256xf32>
      %c0_6 = arith.constant 0 : index
      %c0_7 = arith.constant 0 : index
      %8 = vector.load %arg5[%c0_6, %c0_7] : memref<1x256xf32, #tpu.memory_space<vmem>>, vector<1x256xf32>
      %9 = vector.broadcast %8 : vector<1x256xf32> to vector<2x256xf32>
      %10 = arith.addf %7, %9 : vector<2x256xf32>
      %cst = arith.constant 0.000000e+00 : f32
      %11 = vector.broadcast %cst : f32 to vector<2x256xf32>
      %12 = arith.maximumf %10, %11 : vector<2x256xf32>
      %13 = math.log1p %12 : vector<2x256xf32>
      %c0_8 = arith.constant 0 : index
      %c0_9 = arith.constant 0 : index
      %14 = vector.load %arg7[%c0_8, %c0_9] : memref<2x256xf32, #tpu.memory_space<vmem>>, vector<2x256xf32>
      tpu.vector_store %arg7[%c0_8, %c0_9], %13 {strides = array<i32>} : memref<2x256xf32, #tpu.memory_space<vmem>>, vector<2x256xf32>,
    } else {
    }
    return
  }
  func.func @transform_0(%arg0: i32, %arg1: i32, %arg2: i32) -> (i32, i32, i32) {
    %c0_i32 = arith.constant 0 : i32
    %c0_i32_0 = arith.constant 0 : i32
    return %arg1, %arg2, %c0_i32 : i32, i32, i32
  }
  func.func @transform_1(%arg0: i32, %arg1: i32, %arg2: i32) -> (i32, i32) {
    %c0_i32 = arith.constant 0 : i32
    %c0_i32_0 = arith.constant 0 : i32
    return %c0_i32, %arg0 : i32, i32
  }
  func.func @transform_2(%arg0: i32, %arg1: i32, %arg2: i32) -> (i32, i32) {
    %c0_i32 = arith.constant 0 : i32
    %c0_i32_0 = arith.constant 0 : i32
    return %c0_i32, %arg0 : i32, i32
  }
  func.func @transform_3(%arg0: i32, %arg1: i32, %arg2: i32) -> (i32, i32, i32) {
    %c0_i32 = arith.constant 0 : i32
    %c0_i32_0 = arith.constant 0 : i32
    return %arg1, %arg2, %c0_i32 : i32, i32, i32
  }
  func.func @transform_4(%arg0: i32, %arg1: i32, %arg2: i32) -> (i32, i32) {
    %c0_i32 = arith.constant 0 : i32
    return %arg1, %arg0 : i32, i32
  }
}

</mosaic_0001>

<bundles_post_ra>
// kernel: tpu_custom_call.1
= control target key start
LH: loop header
LB: loop body
LE: loop exit
PB: predicated region body
PF: predicated region fallthrough
CT: control target
= control target key end

     0   :  { %9 = vsyncpa [#allocation4], 0  ;;  %s400_s0 = inlined_call_operand.vmem [shape: bf16[2,8,32], index: 0, kind: input, shape index: {}]   ;;  %s401_s1 = inlined_call_operand.hbm [shape: bf16[32,256], index: 1, kind: input, shape index: {}]   ;;  %s402_s2 = inlined_call_operand.vmem [shape: f32[1,256], index: 2, kind: input, shape index: {}]   ;;  %s403_s3 = inlined_call_operand.vmem [shape: f32[2,8,1], index: 3, kind: input, shape index: {}]   ;;  %s404_s4 = inlined_call_operand.hbm [shape: f32[2,256], index: 4, kind: output, shape index: {}]  }
   0x1   :  { %10 = vsyncpa [#allocation5], 0  ;;  %s322_s15 = smov [#allocation3]   ;;  %s266_s19 = scalar_lea.hbm %s401_s1, 512 }
   0x2   :  { %s18_s16 = sshll.u32 %s322_s15, 4  ;;  %p267_p0 = scmp.ne.s32.totalorder %s401_s1, %s266_s19  ;;  %s19_s16 = int_to_ptr.vmem [resolvable:$true] %s18_s16 }
   0x3   :  { %p270_p1 = scmp.lt.u32.totalorder %s266_s19, %s401_s1 }
   0x5   :  { %p272_p2 = pnand %p270_p1, %p267_p0 }
   0x7   :  { %275 = shalt.err (!%p272_p2)
}
   0x8   :  { %s276_s24 = scalar_lea.vmem %s19_s16, 512  ;;  %p281_p4 = scmp.lt.s32.totalorder %s19_s16, %s19_s16 }
   0x9   :  { %p277_p3 = scmp.ne.s32.totalorder %s19_s16, %s276_s24  ;;  %p282_p5 = scmp.lt.s32.totalorder %s276_s24, %s276_s24 }
   0xb   :  { %p283_p6 = por %p282_p5, %p281_p4 }
   0xd   :  { %p284_p7 = pnand %p283_p6, %p277_p3 }
   0xf   :  { %287 = shalt.err (!%p284_p7)
}
  0x10   :  { %s323_s25 = smov 128   ;;  %s324_s26 = smov 8  }
  0x11   :  { %24 = dma.hbm_to_vmem [thread:$0]  %s401_s1, 512, %s19_s16, [#allocation4], %s323_s25, %s323_s25, %s324_s26  }
  0x12   :  { %314 = dma.done.wait [#allocation4], 512  }
  0x13   :  { %315 = vsyncadd [#allocation4], 4294966784  ;;  %v325_v0 = vmov -1e+30   ;;  %s367_s29 = smov 0  }
  0x14   :  { %37 = vst [vmem:[#allocation2] sm:$0xf] %v325_v0 }
  0x15 LB: > { %v258_v1 = vld [vmem:[#allocation3 + $0x4] ss:$8 sps:$4 sm:$0xff]   ;;  %v260_v2 = vld [vmem:[#allocation3] ss:$8 sps:$4 sm:$0xff]   ;;  %v326_v3 = vmov 0   ;;  %s231_s1 = sshll.u32 %s320_s29, 2  ;;  %v151_v21 = vlaneseq  ;;  %s320_s29 = sphi %s367_s29, %s43_s29  }
  0x16   : > { %115 = vmatprep.mubr.bf16.mxu0 %v326_v3  ;;  %257 = vset.pattern.permute.xlu0 %v326_v3  ;;  %v261_v4 = vld [vmem:[#allocation3 + $0x14] ss:$8 sps:$4 sm:$0xff]   ;;  %v263_v5 = vld [vmem:[#allocation3 + $0x10] ss:$8 sps:$4 sm:$0xff]   ;;  %s45_s6 = scalar_lea.vmem %s400_s0, %s231_s1  ;;  %s232_s7 = sshll.u32 %s320_s29, 3  ;;  %vm79_vm0 = vcmask 261120  }
  0x17   : > { %83 = vmatprep.subr.bf16.mxu0 %v258_v1  ;;  %s52_s10 = scalar_lea.vmem %s403_s3, %s232_s7  ;;  %v46_v7 = vld [vmem:[%s45_s6] sm:$0xf]  ;;  %v327_v19 = vmov 1966171168   ;;  %s136_s11 = sshra.s32 %s320_s29, 1  ;;  %v152_v27 = vshrl.u32 %v151_v21, 7 }
  0x18   : > { %84 = vmatpush1.bf16.msra.mxu0 %v260_v2  ;;  %v53_v6 = vld [vmem:[%s52_s10] sm:$0xff]  ;;  %v149_v20 = vunpack.c.l.s4 %v327_v19  ;;  %s139_s12 = sand.u32 1, %s320_s29  ;;  %s240_s13 = sshll.u32 %s136_s11, 2  ;;  %vm166_vm1 = vcmp.lt.s32.totalorder %v151_v21, 256 }
  0x19   : > { %85 = vmatprep.subr.bf16.mxu0 %v261_v4  ;;  %56 = vperm.xlu0 %257, %v53_v6   ;;  %s142_s14 = sadd.s32 %s240_s13, %s139_s12  ;;  %s43_s29 = sadd.s32 1, %s320_s29  }
  0x1a   : > { %v150_v26 = vunpack.c.0.s8 %v149_v20  ;;  %s143_s15 = scalar_lea.vmem [#allocation2], %s142_s14  ;;  %p40_p8 = scmp.ge.s32.totalorder %s43_s29, 2  }
  0x1b   : > { %v144_v35 = vld [vmem:[%s143_s15] ss:$2 sm:$0x3]  ;;  %v177_v39 = vsub.s32 (%p40_p8), 0, %v152_v27  ;;  %v181_v40 = vsub.s32 (%p40_p8), 1, %v152_v27  ;;  %s329_s0 = smov (%p40_p8), [#allocation6]  }
  0x1c   : > { %86 = vmatpush1.bf16.msra.mxu0 %v263_v5  ;;  %v153_v32 = vsub.s32 %v150_v26, %v152_v27  ;;  %v173_v38 = vld [vmem:[%s402_s2] sm:$0x3] (%p40_p8)  ;;  %v328_v43 = vmov (%p40_p8), 1983009808   ;;  %s210_s2 = sshll.u32 (%p40_p8), %s329_s0, 4  ;;  %s211_s2 = int_to_ptr.vmem [resolvable:$true] %s210_s2 }
  0x1d   :  { %v178_v41 = vrot.slane (%p40_p8), %v173_v38, %v177_v39  ;;  %v182_v42 = vrot.slane (%p40_p8), %v173_v38, %v181_v40  ;;  %v185_v44 = vunpack.c.l.s4 (%p40_p8), %v328_v43  ;;  %s288_s3 = scalar_lea.vmem (%p40_p8), %s211_s2, 64  ;;  %p293_p10 = scmp.lt.s32.totalorder (%p40_p8), %s211_s2, %s211_s2 }
  0x1e   :  { %p289_p9 = scmp.ne.s32.totalorder (%p40_p8), %s211_s2, %s288_s3  ;;  %p294_p11 = scmp.lt.s32.totalorder (%p40_p8), %s288_s3, %s288_s3 }
  0x1f   : > { %237 = vmatmul.mubr.msk.bf16.vlgmr.msra.gmra.mrb[0].mxu0 %vm79_vm0, %v46_v7  ;;  %v183_v45 = vcombine.low (%p40_p8), %v178_v41, %v182_v42  ;;  %v186_v46 = vunpack.c.0.s8 (%p40_p8), %v185_v44 }
  0x20   :  { %p295_p12 = por (%p40_p8), %p294_p11, %p293_p10 }
  0x21   :  { %v189_v47 = vsub.s32 (%p40_p8), %v186_v46, %v152_v27 }
  0x22   :  { %p296_p13 = pnand (%p40_p8), %p295_p12, %p289_p9 }
  0x23   :  { %v190_v49 = vrot.slane (%p40_p8), %v183_v45, %v189_v47 }
  0x98   : > { %v57_v8 = vpop.permute.xlu0 %56 }
  0xf2   : > { %v117_v9 = vpop.f32.mrb[0].mxu0 }
  0xf3   : > { %v118_v10 = vadd.f32 %v117_v9, %v57_v8  ;;  %v119_v11 = vpop.f32.mrb[1].mxu0 }
  0xf4   : > { %v120_v12 = vadd.f32 %v119_v11, %v57_v8  ;;  %v121_v13 = vpop.f32.mrb[2].mxu0 }
  0xf5   : > { %v124_v14 = vrot.slane %v118_v10, 4  ;;  %v122_v15 = vpop.f32.mrb[3].mxu0 }
  0xf6   : > { %v130_v16 = vrot.slane %v120_v12, 4 }
  0xf7   : > { %v125_v17 = vmax.f32 %v118_v10, %v124_v14 }
  0xf8   : > { %v131_v18 = vmax.f32 %v120_v12, %v130_v16 }
  0xf9   : > { %v126_v22 = vrot.slane %v125_v17, 2 }
  0xfa   : > { %v132_v23 = vrot.slane %v131_v18, 2 }
  0xfb   : > { %v127_v24 = vmax.f32 %v125_v17, %v126_v22 }
  0xfc   : > { %v133_v25 = vmax.f32 %v131_v18, %v132_v23 }
  0xfd   : > { %v128_v28 = vrot.slane %v127_v24, 1 }
  0xfe   : > { %v134_v29 = vrot.slane %v133_v25, 1 }
  0xff   : > { %v129_v30 = vmax.f32 %v127_v24, %v128_v28 }
 0x100   : > { %v135_v31 = vmax.f32 %v133_v25, %v134_v29 }
 0x102   : > { %v147_v33 = vcombine.low %v129_v30, %v135_v31 }
 0x104   : > { %v154_v34 = vrot.slane %v147_v33, %v153_v32  ;;  %42 = sbr.rel (!%p40_p8) target bundleno = 21 (0x15), region = 58 }
 0x106   : > { %v161_v36 = vrot.slane %v154_v34, %v153_v32 }
 0x108   : > { %v163_v37 = vmax.f32 %v144_v35, %v161_v36 }
 0x10a   : > { %168 = vst.msk [vmem:[%s143_s15] ss:$2 sm:$0x3] %vm166_vm1, %v163_v37 }
 0x111   :  { %v172_v48 = vld [vmem:[#allocation2] sm:$0xf] }
 0x112   :  { %v192_v50 = vadd.f32 %v190_v49, %v172_v48 }
 0x114   :  { %v193_v51 = vmax.f32 %v192_v50, 0.0 }
 0x116   :  { %v194_v52 = vadd.f32 1.0, %v193_v51  ;;  %v197_v53 = vmul.f32 -0.5, %v193_v51  ;;  %v200_v55 = vand.u32 2147483647, %v193_v51 }
 0x118   :  { %264 = vlog2.f32 %v194_v52  ;;  %v198_v54 = vadd.f32 1.0, %v197_v53  ;;  %vm201_vm2 = vcmp.lt.f32.partialorder %v200_v55, 0.0004427343 }
 0x11a   :  { %v199_v56 = vmul.f32 %v198_v54, %v193_v51 }
 0x122   :  { %v265_v57 = vpop.eup %264 }
 0x123   :  { %v196_v58 = vmul.f32 0.6931472, %v265_v57 }
 0x125   :  { %v202_v59 = vsel %vm201_vm2, %v199_v56, %v196_v58 }
 0x126   :  { %203 = vst [vmem:[#allocation6] sm:$0xf] %v202_v59 }
 0x127   :  { %299 = shalt.err (!%p296_p13)
}
 0x128   :  { %s300_s20 = scalar_lea.hbm %s404_s4, 64 }
 0x129   :  { %p301_p0 = scmp.ne.s32.totalorder %s404_s4, %s300_s20  ;;  %p304_p1 = scmp.lt.u32.totalorder %s300_s20, %s404_s4 }
 0x12b   :  { %p306_p2 = pnand %p304_p1, %p301_p0 }
 0x12d   :  { %309 = shalt.err (!%p306_p2)
}
 0x12e   :  { %213 = dma.vmem_to_hbm [thread:$0]  %s211_s2, 64, %s404_s4, [#allocation5]  }
 0x12f   :  { %316 = dma.done.wait [#allocation5], 64  }
 0x130   :  { %317 = vsyncadd [#allocation5], 4294967232 }
 0x131   :  { %217 = vsyncpa [#allocation4], 1 }
 0x132   :  { %218 = vsyncpa [#allocation5], 1 }

</bundles_post_ra>
